<compile_context>
chip_gen: v5e
topology: v5e:2x2
jax: 0.10.0
libtpu: 0.0.40
codegen_flags: <defaults>
</compile_context>

<pallas_src>
import numpy as np
import jax
import jax.numpy as jnp
from jax import lax
from jax.experimental import pallas as pl
from jax.experimental.pallas import tpu as pltpu


def _round_up(n, m):
    return (n + m - 1) // m * m


# ---------------------------------------------------------------------------
# Fused kernel: GAT (recomputed per step) + one-hot gather + text MLP +
#               fc_final + log_softmax, lane-dense bf16 output.
# ---------------------------------------------------------------------------
def fused_kernel(x_ref, sel_ref,
                 gx_ref, adj_ref,
                 gw1_ref, ga1s_ref, ga1d_ref, gb1_ref,
                 gw2_ref, ga2s_ref, ga2d_ref, gb2_ref,
                 w1_ref, b1_ref, w2_ref, b2_ref, w3_ref, b3_ref,
                 w4_ref, ws_ref, bcat_ref,
                 wft_ref, wfg_ref, bf_ref,
                 o_ref):
    cdt = jnp.bfloat16
    f32 = jnp.float32

    # ---- GAT over the (small) graph: dense masked attention, all f32 ---------
    adj = adj_ref[...]                               # (N, N), self-loops included
    nbr_mask = adj > 0.0
    neg = jnp.float32(-1e30)

    def gat_attend(s_h, a_src, a_dst):
        # s_h: (N, D); a_src / a_dst: (1, D).   e[i, j] = a_dst.s_i + a_src.s_j
        adst = jnp.sum(s_h * a_dst, axis=-1, keepdims=True)              # (N, 1)
        asrc = lax.dot_general(a_src, s_h, (((1,), (1,)), ((), ())),
                               preferred_element_type=f32)               # (1, N)
        e = adst + asrc
        e = jnp.where(e >= 0.0, e, 0.2 * e)                              # LeakyReLU(0.2)
        e = jnp.where(nbr_mask, e, neg)
        e = e - jnp.max(e, axis=-1, keepdims=True)
        p = jnp.where(nbr_mask, jnp.exp(e), 0.0)
        alpha = p / jnp.sum(p, axis=-1, keepdims=True)                   # softmax over nbrs
        return jnp.dot(alpha, s_h, preferred_element_type=f32)           # (N, D)

    # layer 1: one projection, sliced per head (heads=2, concat=True)
    s_all = jnp.dot(gx_ref[...], gw1_ref[...], preferred_element_type=f32)   # (N, 2*hid)
    heads1 = ga1s_ref.shape[0]
    d1 = ga1s_ref.shape[1]
    h1_parts = []
    for hd in range(heads1):
        s_h = s_all[:, hd * d1:(hd + 1) * d1]
        h1_parts.append(gat_attend(s_h, ga1s_ref[hd:hd + 1, :], ga1d_ref[hd:hd + 1, :]))
    h1 = jnp.concatenate(h1_parts, axis=1) + gb1_ref[...]
    h1 = jnp.maximum(h1, 0.0)                                            # ReLU between convs

    # layer 2: heads=1, concat=False
    s2 = jnp.dot(h1, gw2_ref[...], preferred_element_type=f32)
    gnn = gat_attend(s2, ga2s_ref[...], ga2d_ref[...]) + gb2_ref[...]    # (N, out_dim)

    # ---- gnn_out[mask] gather as a one-hot matmul (exact) ---------------------
    gnn_sel = jnp.dot(sel_ref[...], gnn.astype(cdt),
                      preferred_element_type=f32)                        # (TB, out_dim)

    # ---- text MLP: bf16 MXU operands, f32 accumulate / bias / ReLU ------------
    x = x_ref[...]                                                       # (TB, text_dim) bf16
    h = jnp.dot(x, w1_ref[...], preferred_element_type=f32) + b1_ref[...]
    h = jnp.maximum(h, 0.0)
    h = jnp.dot(h.astype(cdt), w2_ref[...], preferred_element_type=f32) + b2_ref[...]
    h = jnp.maximum(h, 0.0)
    h = jnp.dot(h.astype(cdt), w3_ref[...], preferred_element_type=f32) + b3_ref[...]
    h = jnp.maximum(h, 0.0)
    # fc4 + shortcut: two dots (no in-kernel lane concat); bias pre-folded (b4 + bs)
    text_out = (jnp.dot(h.astype(cdt), w4_ref[...], preferred_element_type=f32)
                + jnp.dot(x, ws_ref[...], preferred_element_type=f32)
                + bcat_ref[...])                                         # (TB, out_dim)

    # ---- fc_final over [text_out || gnn_sel] with split weights ---------------
    logits = (jnp.dot(text_out.astype(cdt), wft_ref[...], preferred_element_type=f32)
              + jnp.dot(gnn_sel.astype(cdt), wfg_ref[...], preferred_element_type=f32)
              + bf_ref[...])                                             # (TB, 128) f32

    # log_softmax over all 128 lanes; padded lanes carry bias = -1e30 -> exact
    m = jnp.max(logits, axis=-1, keepdims=True)
    s = logits - m
    lse = jnp.log(jnp.sum(jnp.exp(s), axis=-1, keepdims=True))
    o_ref[...] = (s - lse).astype(o_ref.dtype)                           # bf16 cast AFTER f32 math


# ---------------------------------------------------------------------------
# One-time weight preprocessing (hoisted off the per-call hot path)
# ---------------------------------------------------------------------------
def prepare_params(p):
    cdt = jnp.bfloat16
    out_dim = p["wf"].shape[1]
    out_pad = max(128, _round_up(out_dim, 128))     # lane-dense output slab width
    wf = p["wf"]
    wft = jnp.zeros((out_dim, out_pad), jnp.float32).at[:, :out_dim].set(wf[:out_dim]).astype(cdt)
    wfg = jnp.zeros((out_dim, out_pad), jnp.float32).at[:, :out_dim].set(wf[out_dim:]).astype(cdt)
    bfp = jnp.full((1, out_pad), -1e30, jnp.float32).at[:, :out_dim].set(p["bf"])
    return dict(
        out_dim=out_dim, out_pad=out_pad,
        g_w1=p["g_w1"], g_a1_src=p["g_a1_src"], g_a1_dst=p["g_a1_dst"], g_b1=p["g_b1"],
        g_w2=p["g_w2"], g_a2_src=p["g_a2_src"], g_a2_dst=p["g_a2_dst"], g_b2=p["g_b2"],
        w1=p["w1"].astype(cdt), b1=p["b1"],
        w2=p["w2"].astype(cdt), b2=p["b2"],
        w3=p["w3"].astype(cdt), b3=p["b3"],
        w4=p["w4"].astype(cdt), ws=p["ws"].astype(cdt),
        bcat=p["b4"] + p["bs"],
        wft=wft, wfg=wfg, bfp=bfp,
    )


def hybrid_forward(text_x, graph_x, adj, mask_idx, prep):
    B, _ = text_x.shape
    n_nodes = graph_x.shape[0]
    out_dim = prep["out_dim"]
    out_pad = prep["out_pad"]

    # batch tile: >=2 grid steps on v7x for a few-hundred batch; sweep 512-2048 for huge B
    TB = min(512, _round_up(B, 8))
    b_pad = _round_up(B, TB)

    x_bf = text_x.astype(jnp.bfloat16)                                 # halved input stream
    sel = jax.nn.one_hot(mask_idx, n_nodes, dtype=jnp.bfloat16)        # (B, N), exact 0/1
    if b_pad != B:
        x_bf = jnp.pad(x_bf, ((0, b_pad - B), (0, 0)))
        sel = jnp.pad(sel, ((0, b_pad - B), (0, 0)))

    args = (x_bf, sel,
            graph_x, adj,
            prep["g_w1"], prep["g_a1_src"], prep["g_a1_dst"], prep["g_b1"],
            prep["g_w2"], prep["g_a2_src"], prep["g_a2_dst"], prep["g_b2"],
            prep["w1"], prep["b1"], prep["w2"], prep["b2"], prep["w3"], prep["b3"],
            prep["w4"], prep["ws"], prep["bcat"],
            prep["wft"], prep["wfg"], prep["bfp"])

    def tile_spec(shape):            # batch-tiled streams
        return pl.BlockSpec((TB, shape[1]), lambda i: (i, 0))

    def resident_spec(shape):        # graph / weights: constant index -> stay VMEM-resident
        return pl.BlockSpec(shape, lambda i: (0,) * len(shape))

    in_specs = ([tile_spec(x_bf.shape), tile_spec(sel.shape)]
                + [resident_spec(a.shape) for a in args[2:]])

    out = pl.pallas_call(
        fused_kernel,
        out_shape=jax.ShapeDtypeStruct((b_pad, out_pad), jnp.bfloat16),
        grid_spec=pltpu.PrefetchScalarGridSpec(
            num_scalar_prefetch=0,
            grid=(b_pad // TB,),
            in_specs=in_specs,
            out_specs=pl.BlockSpec((TB, out_pad), lambda i: (i, 0)),
        ),
        compiler_params=pltpu.CompilerParams(
            dimension_semantics=("parallel",)),
    )(*args)
    return out[:B, :out_dim]


# ---------------------------------------------------------------------------
# Parameters + pure-JAX reference of the PyTorch forward
# ---------------------------------------------------------------------------
def init_params(key, text_dim, gnn_dim, hidden_dim, output_dim, scale=0.1):
    shapes = dict(
        w1=(text_dim, 128), b1=(1, 128),
        w2=(128, 64),       b2=(1, 64),
        w3=(64, 16),        b3=(1, 16),
        w4=(16, output_dim), b4=(1, output_dim),
        ws=(text_dim, output_dim), bs=(1, output_dim),
        g_w1=(gnn_dim, 2 * hidden_dim),
        g_a1_src=(2, hidden_dim), g_a1_dst=(2, hidden_dim),
        g_b1=(1, 2 * hidden_dim),
        g_w2=(2 * hidden_dim, output_dim),
        g_a2_src=(1, output_dim), g_a2_dst=(1, output_dim),
        g_b2=(1, output_dim),
        wf=(2 * output_dim, output_dim), bf=(1, output_dim),
    )
    keys = jax.random.split(key, len(shapes))
    return {n: scale * jax.random.normal(k, s, dtype=jnp.float32)
            for (n, s), k in zip(shapes.items(), keys)}


def ref_forward(text_x, graph_x, adj, mask_idx, p):
    # text MLP (fc1..fc4 + shortcut)
    h = jax.nn.relu(text_x @ p["w1"] + p["b1"])
    h = jax.nn.relu(h @ p["w2"] + p["b2"])
    h = jax.nn.relu(h @ p["w3"] + p["b3"])
    text_out = h @ p["w4"] + p["b4"] + text_x @ p["ws"] + p["bs"]

    # dense GAT reference
    # TODO(synk): attention src/dst orientation matches this in-file reference; validate once
    # against torch_geometric's GATConv outputs for the real model.
    def gat_layer(h, w, a_src, a_dst, b, heads, d):
        s = h @ w
        outs = []
        for hd in range(heads):
            sh = s[:, hd * d:(hd + 1) * d]
            adst = (sh * a_dst[hd]).sum(-1, keepdims=True)          # (N, 1)
            asrc = (sh * a_src[hd]).sum(-1, keepdims=True).T        # (1, N)
            e = adst + asrc
            e = jnp.where(e >= 0.0, e, 0.2 * e)
            e = jnp.where(adj > 0.0, e, -1e30)
            e = e - e.max(-1, keepdims=True)
            pe = jnp.where(adj > 0.0, jnp.exp(e), 0.0)
            alpha = pe / pe.sum(-1, keepdims=True)
            outs.append(alpha @ sh)
        return jnp.concatenate(outs, axis=1) + b

    g = jax.nn.relu(gat_layer(graph_x, p["g_w1"], p["g_a1_src"], p["g_a1_dst"],
                              p["g_b1"], heads=2, d=p["g_a1_src"].shape[1]))
    g = gat_layer(g, p["g_w2"], p["g_a2_src"], p["g_a2_dst"], p["g_b2"],
                  heads=1, d=p["g_a2_src"].shape[1])
    g_sel = g[mask_idx]

    combined = jnp.concatenate([text_out, g_sel], axis=1)
    return jax.nn.log_softmax(combined @ p["wf"] + p["bf"], axis=1)


if __name__ == "__main__":
    text_dim, gnn_dim, hidden_dim, output_dim = 32, 16, 32, 16
    n_nodes = 16

    # small two-"domain" graph (complete within each domain), like the original preprocessing
    adj_np = np.zeros((n_nodes, n_nodes), np.float32)
    for dom in (range(0, 8), range(8, 16)):
        for src in dom:
            for dst in dom:
                if src != dst:
                    adj_np[dst, src] = 1.0
    adj_np += np.eye(n_nodes, dtype=np.float32)   # GATConv add_self_loops
    adj = jnp.asarray(adj_np)

    mask_np = np.zeros(n_nodes, bool)
    mask_np[::2] = True                           # 8 masked nodes == 8 text rows
    mask_idx = jnp.asarray(np.nonzero(mask_np)[0].astype(np.int32))
    B = int(mask_np.sum())

    key = jax.random.PRNGKey(0)
    k_text, k_graph, k_param = jax.random.split(key, 3)
    text_x = jax.random.normal(k_text, (B, text_dim), dtype=jnp.float32)
    graph_x = jax.random.normal(k_graph, (n_nodes, gnn_dim), dtype=jnp.float32)
    params = init_params(k_param, text_dim, gnn_dim, hidden_dim, output_dim)

    prep = prepare_params(params)                 # one-time weight prep, off the hot path
    out = hybrid_forward(text_x, graph_x, adj, mask_idx, prep)
    out = jax.block_until_ready(out)

    ref = ref_forward(text_x, graph_x, adj, mask_idx, params)
    assert out.shape == (B, output_dim), out.shape
    out_f32 = out.astype(jnp.float32)
    assert bool(jnp.all(jnp.isfinite(out_f32)))
    # kernel uses bf16 MXU operands + bf16 output store vs a pure-f32 reference
    assert jnp.allclose(out_f32, ref, atol=5e-2, rtol=5e-2), float(jnp.max(jnp.abs(out_f32 - ref)))

    print("KERNEL_OK")
</pallas_src>

<mosaic_0001>
module attributes {stable_mosaic.version = 11 : i64} {
  func.func @fused_kernel(%arg0: i32, %arg1: memref<8x32xbf16, #tpu.memory_space<vmem>>, %arg2: memref<8x16xbf16, #tpu.memory_space<vmem>>, %arg3: memref<16x16xf32, #tpu.memory_space<vmem>>, %arg4: memref<16x16xf32, #tpu.memory_space<vmem>>, %arg5: memref<16x64xf32, #tpu.memory_space<vmem>>, %arg6: memref<2x32xf32, #tpu.memory_space<vmem>>, %arg7: memref<2x32xf32, #tpu.memory_space<vmem>>, %arg8: memref<1x64xf32, #tpu.memory_space<vmem>>, %arg9: memref<64x16xf32, #tpu.memory_space<vmem>>, %arg10: memref<1x16xf32, #tpu.memory_space<vmem>>, %arg11: memref<1x16xf32, #tpu.memory_space<vmem>>, %arg12: memref<1x16xf32, #tpu.memory_space<vmem>>, %arg13: memref<32x128xbf16, #tpu.memory_space<vmem>>, %arg14: memref<1x128xf32, #tpu.memory_space<vmem>>, %arg15: memref<128x64xbf16, #tpu.memory_space<vmem>>, %arg16: memref<1x64xf32, #tpu.memory_space<vmem>>, %arg17: memref<64x16xbf16, #tpu.memory_space<vmem>>, %arg18: memref<1x16xf32, #tpu.memory_space<vmem>>, %arg19: memref<16x16xbf16, #tpu.memory_space<vmem>>, %arg20: memref<32x16xbf16, #tpu.memory_space<vmem>>, %arg21: memref<1x16xf32, #tpu.memory_space<vmem>>, %arg22: memref<16x128xbf16, #tpu.memory_space<vmem>>, %arg23: memref<16x128xbf16, #tpu.memory_space<vmem>>, %arg24: memref<1x128xf32, #tpu.memory_space<vmem>>, %arg25: memref<8x128xbf16, #tpu.memory_space<vmem>>) attributes {dimension_semantics = [#tpu.dimension_semantics<parallel>], iteration_bounds = array<i64: 1>, scalar_prefetch = 0 : i64, scratch_operands = 0 : i64, tpu.core_type = #tpu.core_type<tc>, window_params = [{transform_indices = @transform_0, window_bounds = array<i64: 8, 32>}, {transform_indices = @transform_1, window_bounds = array<i64: 8, 16>}, {pipeline_mode = #tpu.pipeline_mode<synchronous>, transform_indices = @transform_2, window_bounds = array<i64: 16, 16>}, {pipeline_mode = #tpu.pipeline_mode<synchronous>, transform_indices = @transform_3, window_bounds = array<i64: 16, 16>}, {pipeline_mode = #tpu.pipeline_mode<synchronous>, transform_indices = @transform_4, window_bounds = array<i64: 16, 64>}, {pipeline_mode = #tpu.pipeline_mode<synchronous>, transform_indices = @transform_5, window_bounds = array<i64: 2, 32>}, {pipeline_mode = #tpu.pipeline_mode<synchronous>, transform_indices = @transform_6, window_bounds = array<i64: 2, 32>}, {pipeline_mode = #tpu.pipeline_mode<synchronous>, transform_indices = @transform_7, window_bounds = array<i64: 1, 64>}, {pipeline_mode = #tpu.pipeline_mode<synchronous>, transform_indices = @transform_8, window_bounds = array<i64: 64, 16>}, {pipeline_mode = #tpu.pipeline_mode<synchronous>, transform_indices = @transform_9, window_bounds = array<i64: 1, 16>}, {pipeline_mode = #tpu.pipeline_mode<synchronous>, transform_indices = @transform_10, window_bounds = array<i64: 1, 16>}, {pipeline_mode = #tpu.pipeline_mode<synchronous>, transform_indices = @transform_11, window_bounds = array<i64: 1, 16>}, {pipeline_mode = #tpu.pipeline_mode<synchronous>, transform_indices = @transform_12, window_bounds = array<i64: 32, 128>}, {pipeline_mode = #tpu.pipeline_mode<synchronous>, transform_indices = @transform_13, window_bounds = array<i64: 1, 128>}, {pipeline_mode = #tpu.pipeline_mode<synchronous>, transform_indices = @transform_14, window_bounds = array<i64: 128, 64>}, {pipeline_mode = #tpu.pipeline_mode<synchronous>, transform_indices = @transform_15, window_bounds = array<i64: 1, 64>}, {pipeline_mode = #tpu.pipeline_mode<synchronous>, transform_indices = @transform_16, window_bounds = array<i64: 64, 16>}, {pipeline_mode = #tpu.pipeline_mode<synchronous>, transform_indices = @transform_17, window_bounds = array<i64: 1, 16>}, {pipeline_mode = #tpu.pipeline_mode<synchronous>, transform_indices = @transform_18, window_bounds = array<i64: 16, 16>}, {pipeline_mode = #tpu.pipeline_mode<synchronous>, transform_indices = @transform_19, window_bounds = array<i64: 32, 16>}, {pipeline_mode = #tpu.pipeline_mode<synchronous>, transform_indices = @transform_20, window_bounds = array<i64: 1, 16>}, {pipeline_mode = #tpu.pipeline_mode<synchronous>, transform_indices = @transform_21, window_bounds = array<i64: 16, 128>}, {pipeline_mode = #tpu.pipeline_mode<synchronous>, transform_indices = @transform_22, window_bounds = array<i64: 16, 128>}, {pipeline_mode = #tpu.pipeline_mode<synchronous>, transform_indices = @transform_23, window_bounds = array<i64: 1, 128>}, {transform_indices = @transform_24, window_bounds = array<i64: 8, 128>}]} {
    %c0 = arith.constant 0 : index
    %c0_0 = arith.constant 0 : index
    %0 = vector.load %arg4[%c0, %c0_0] : memref<16x16xf32, #tpu.memory_space<vmem>>, vector<16x16xf32>
    %cst = arith.constant 0.000000e+00 : f32
    %1 = vector.broadcast %cst : f32 to vector<16x16xf32>
    %2 = arith.cmpf ogt, %0, %1 : vector<16x16xf32>
    %c0_1 = arith.constant 0 : index
    %c0_2 = arith.constant 0 : index
    %3 = vector.load %arg3[%c0_1, %c0_2] : memref<16x16xf32, #tpu.memory_space<vmem>>, vector<16x16xf32>
    %c0_3 = arith.constant 0 : index
    %c0_4 = arith.constant 0 : index
    %4 = vector.load %arg5[%c0_3, %c0_4] : memref<16x64xf32, #tpu.memory_space<vmem>>, vector<16x64xf32>
    %cst_5 = arith.constant dense<0.000000e+00> : vector<16x64xf32>
    %5 = tpu.matmul %3, %4, %cst_5 {dimension_numbers = #tpu.dot_dimension_numbers<[1], [0], [0], [1], [0, 0, 1, 1], [], []>} : vector<16x16xf32>, vector<16x64xf32>, vector<16x64xf32> -> vector<16x64xf32>
    %6 = vector.extract_strided_slice %5 {offsets = [0, 0], sizes = [16, 32], strides = [1, 1]} : vector<16x64xf32> to vector<16x32xf32>
    %c0_6 = arith.constant 0 : index
    %c0_7 = arith.constant 0 : index
    %7 = vector.load %arg6[%c0_6, %c0_7] : memref<2x32xf32, #tpu.memory_space<vmem>>, vector<1x32xf32>
    %c0_8 = arith.constant 0 : index
    %c0_9 = arith.constant 0 : index
    %8 = vector.load %arg7[%c0_8, %c0_9] : memref<2x32xf32, #tpu.memory_space<vmem>>, vector<1x32xf32>
    %9 = vector.broadcast %8 : vector<1x32xf32> to vector<16x32xf32>
    %10 = arith.mulf %6, %9 : vector<16x32xf32>
    %cst_10 = arith.constant dense<0.000000e+00> : vector<16xf32>
    %11 = vector.multi_reduction <add>, %10, %cst_10 [1] : vector<16x32xf32> to vector<16xf32>
    %12 = vector.shape_cast %11 : vector<16xf32> to vector<16x1xf32>
    %cst_11 = arith.constant dense<0.000000e+00> : vector<1x16xf32>
    %13 = tpu.matmul %7, %6, %cst_11 {dimension_numbers = #tpu.dot_dimension_numbers<[1], [1], [0], [0], [0, 0, 1, 0], [], []>} : vector<1x32xf32>, vector<16x32xf32>, vector<1x16xf32> -> vector<1x16xf32>
    %14 = vector.broadcast %12 : vector<16x1xf32> to vector<16x16xf32>
    %15 = vector.broadcast %13 : vector<1x16xf32> to vector<16x16xf32>
    %16 = arith.addf %14, %15 : vector<16x16xf32>
    %cst_12 = arith.constant 0.000000e+00 : f32
    %17 = vector.broadcast %cst_12 : f32 to vector<16x16xf32>
    %18 = arith.cmpf oge, %16, %17 : vector<16x16xf32>
    %cst_13 = arith.constant 2.000000e-01 : f32
    %19 = vector.broadcast %cst_13 : f32 to vector<16x16xf32>
    %20 = arith.mulf %19, %16 : vector<16x16xf32>
    %21 = arith.select %18, %16, %20 : vector<16x16xi1>, vector<16x16xf32>
    %cst_14 = arith.constant -1.000000e+30 : f32
    %22 = vector.broadcast %cst_14 : f32 to vector<16x16xf32>
    %23 = arith.select %2, %21, %22 : vector<16x16xi1>, vector<16x16xf32>
    %cst_15 = arith.constant dense<0xFF800000> : vector<16xf32>
    %24 = vector.multi_reduction <maximumf>, %23, %cst_15 [1] : vector<16x16xf32> to vector<16xf32>
    %25 = vector.shape_cast %24 : vector<16xf32> to vector<16x1xf32>
    %26 = vector.broadcast %25 : vector<16x1xf32> to vector<16x16xf32>
    %27 = arith.subf %23, %26 : vector<16x16xf32>
    %28 = math.exp %27 : vector<16x16xf32>
    %cst_16 = arith.constant 0.000000e+00 : f32
    %29 = vector.broadcast %cst_16 : f32 to vector<16x16xf32>
    %30 = arith.select %2, %28, %29 : vector<16x16xi1>, vector<16x16xf32>
    %cst_17 = arith.constant dense<0.000000e+00> : vector<16xf32>
    %31 = vector.multi_reduction <add>, %30, %cst_17 [1] : vector<16x16xf32> to vector<16xf32>
    %32 = vector.shape_cast %31 : vector<16xf32> to vector<16x1xf32>
    %33 = vector.broadcast %32 : vector<16x1xf32> to vector<16x16xf32>
    %34 = arith.divf %30, %33 : vector<16x16xf32>
    %cst_18 = arith.constant dense<0.000000e+00> : vector<16x32xf32>
    %35 = tpu.matmul %34, %6, %cst_18 {dimension_numbers = #tpu.dot_dimension_numbers<[1], [0], [0], [1], [0, 0, 1, 1], [], []>} : vector<16x16xf32>, vector<16x32xf32>, vector<16x32xf32> -> vector<16x32xf32>
    %36 = vector.extract_strided_slice %5 {offsets = [0, 32], sizes = [16, 32], strides = [1, 1]} : vector<16x64xf32> to vector<16x32xf32>
    %c1 = arith.constant 1 : index
    %c0_19 = arith.constant 0 : index
    %37 = vector.load %arg6[%c1, %c0_19] : memref<2x32xf32, #tpu.memory_space<vmem>>, vector<1x32xf32>
    %c1_20 = arith.constant 1 : index
    %c0_21 = arith.constant 0 : index
    %38 = vector.load %arg7[%c1_20, %c0_21] : memref<2x32xf32, #tpu.memory_space<vmem>>, vector<1x32xf32>
    %39 = vector.broadcast %38 : vector<1x32xf32> to vector<16x32xf32>
    %40 = arith.mulf %36, %39 : vector<16x32xf32>
    %cst_22 = arith.constant dense<0.000000e+00> : vector<16xf32>
    %41 = vector.multi_reduction <add>, %40, %cst_22 [1] : vector<16x32xf32> to vector<16xf32>
    %42 = vector.shape_cast %41 : vector<16xf32> to vector<16x1xf32>
    %cst_23 = arith.constant dense<0.000000e+00> : vector<1x16xf32>
    %43 = tpu.matmul %37, %36, %cst_23 {dimension_numbers = #tpu.dot_dimension_numbers<[1], [1], [0], [0], [0, 0, 1, 0], [], []>} : vector<1x32xf32>, vector<16x32xf32>, vector<1x16xf32> -> vector<1x16xf32>
    %44 = vector.broadcast %42 : vector<16x1xf32> to vector<16x16xf32>
    %45 = vector.broadcast %43 : vector<1x16xf32> to vector<16x16xf32>
    %46 = arith.addf %44, %45 : vector<16x16xf32>
    %cst_24 = arith.constant 0.000000e+00 : f32
    %47 = vector.broadcast %cst_24 : f32 to vector<16x16xf32>
    %48 = arith.cmpf oge, %46, %47 : vector<16x16xf32>
    %cst_25 = arith.constant 2.000000e-01 : f32
    %49 = vector.broadcast %cst_25 : f32 to vector<16x16xf32>
    %50 = arith.mulf %49, %46 : vector<16x16xf32>
    %51 = arith.select %48, %46, %50 : vector<16x16xi1>, vector<16x16xf32>
    %cst_26 = arith.constant -1.000000e+30 : f32
    %52 = vector.broadcast %cst_26 : f32 to vector<16x16xf32>
    %53 = arith.select %2, %51, %52 : vector<16x16xi1>, vector<16x16xf32>
    %cst_27 = arith.constant dense<0xFF800000> : vector<16xf32>
    %54 = vector.multi_reduction <maximumf>, %53, %cst_27 [1] : vector<16x16xf32> to vector<16xf32>
    %55 = vector.shape_cast %54 : vector<16xf32> to vector<16x1xf32>
    %56 = vector.broadcast %55 : vector<16x1xf32> to vector<16x16xf32>
    %57 = arith.subf %53, %56 : vector<16x16xf32>
    %58 = math.exp %57 : vector<16x16xf32>
    %cst_28 = arith.constant 0.000000e+00 : f32
    %59 = vector.broadcast %cst_28 : f32 to vector<16x16xf32>
    %60 = arith.select %2, %58, %59 : vector<16x16xi1>, vector<16x16xf32>
    %cst_29 = arith.constant dense<0.000000e+00> : vector<16xf32>
    %61 = vector.multi_reduction <add>, %60, %cst_29 [1] : vector<16x16xf32> to vector<16xf32>
    %62 = vector.shape_cast %61 : vector<16xf32> to vector<16x1xf32>
    %63 = vector.broadcast %62 : vector<16x1xf32> to vector<16x16xf32>
    %64 = arith.divf %60, %63 : vector<16x16xf32>
    %cst_30 = arith.constant dense<0.000000e+00> : vector<16x32xf32>
    %65 = tpu.matmul %64, %36, %cst_30 {dimension_numbers = #tpu.dot_dimension_numbers<[1], [0], [0], [1], [0, 0, 1, 1], [], []>} : vector<16x16xf32>, vector<16x32xf32>, vector<16x32xf32> -> vector<16x32xf32>
    %66 = tpu.concatenate %35, %65 in 1 : vector<16x32xf32>, vector<16x32xf32> -> vector<16x64xf32>
    %c0_31 = arith.constant 0 : index
    %c0_32 = arith.constant 0 : index
    %67 = vector.load %arg8[%c0_31, %c0_32] : memref<1x64xf32, #tpu.memory_space<vmem>>, vector<1x64xf32>
    %68 = vector.broadcast %67 : vector<1x64xf32> to vector<16x64xf32>
    %69 = arith.addf %66, %68 : vector<16x64xf32>
    %cst_33 = arith.constant 0.000000e+00 : f32
    %70 = vector.broadcast %cst_33 : f32 to vector<16x64xf32>
    %71 = arith.maximumf %69, %70 : vector<16x64xf32>
    %c0_34 = arith.constant 0 : index
    %c0_35 = arith.constant 0 : index
    %72 = vector.load %arg9[%c0_34, %c0_35] : memref<64x16xf32, #tpu.memory_space<vmem>>, vector<64x16xf32>
    %cst_36 = arith.constant dense<0.000000e+00> : vector<16x16xf32>
    %73 = tpu.matmul %71, %72, %cst_36 {dimension_numbers = #tpu.dot_dimension_numbers<[1], [0], [0], [1], [0, 0, 1, 1], [], []>} : vector<16x64xf32>, vector<64x16xf32>, vector<16x16xf32> -> vector<16x16xf32>
    %c0_37 = arith.constant 0 : index
    %c0_38 = arith.constant 0 : index
    %74 = vector.load %arg10[%c0_37, %c0_38] : memref<1x16xf32, #tpu.memory_space<vmem>>, vector<1x16xf32>
    %c0_39 = arith.constant 0 : index
    %c0_40 = arith.constant 0 : index
    %75 = vector.load %arg11[%c0_39, %c0_40] : memref<1x16xf32, #tpu.memory_space<vmem>>, vector<1x16xf32>
    %76 = vector.broadcast %75 : vector<1x16xf32> to vector<16x16xf32>
    %77 = arith.mulf %73, %76 : vector<16x16xf32>
    %cst_41 = arith.constant dense<0.000000e+00> : vector<16xf32>
    %78 = vector.multi_reduction <add>, %77, %cst_41 [1] : vector<16x16xf32> to vector<16xf32>
    %79 = vector.shape_cast %78 : vector<16xf32> to vector<16x1xf32>
    %cst_42 = arith.constant dense<0.000000e+00> : vector<1x16xf32>
    %80 = tpu.matmul %74, %73, %cst_42 {dimension_numbers = #tpu.dot_dimension_numbers<[1], [1], [0], [0], [0, 0, 1, 0], [], []>} : vector<1x16xf32>, vector<16x16xf32>, vector<1x16xf32> -> vector<1x16xf32>
    %81 = vector.broadcast %79 : vector<16x1xf32> to vector<16x16xf32>
    %82 = vector.broadcast %80 : vector<1x16xf32> to vector<16x16xf32>
    %83 = arith.addf %81, %82 : vector<16x16xf32>
    %cst_43 = arith.constant 0.000000e+00 : f32
    %84 = vector.broadcast %cst_43 : f32 to vector<16x16xf32>
    %85 = arith.cmpf oge, %83, %84 : vector<16x16xf32>
    %cst_44 = arith.constant 2.000000e-01 : f32
    %86 = vector.broadcast %cst_44 : f32 to vector<16x16xf32>
    %87 = arith.mulf %86, %83 : vector<16x16xf32>
    %88 = arith.select %85, %83, %87 : vector<16x16xi1>, vector<16x16xf32>
    %cst_45 = arith.constant -1.000000e+30 : f32
    %89 = vector.broadcast %cst_45 : f32 to vector<16x16xf32>
    %90 = arith.select %2, %88, %89 : vector<16x16xi1>, vector<16x16xf32>
    %cst_46 = arith.constant dense<0xFF800000> : vector<16xf32>
    %91 = vector.multi_reduction <maximumf>, %90, %cst_46 [1] : vector<16x16xf32> to vector<16xf32>
    %92 = vector.shape_cast %91 : vector<16xf32> to vector<16x1xf32>
    %93 = vector.broadcast %92 : vector<16x1xf32> to vector<16x16xf32>
    %94 = arith.subf %90, %93 : vector<16x16xf32>
    %95 = math.exp %94 : vector<16x16xf32>
    %cst_47 = arith.constant 0.000000e+00 : f32
    %96 = vector.broadcast %cst_47 : f32 to vector<16x16xf32>
    %97 = arith.select %2, %95, %96 : vector<16x16xi1>, vector<16x16xf32>
    %cst_48 = arith.constant dense<0.000000e+00> : vector<16xf32>
    %98 = vector.multi_reduction <add>, %97, %cst_48 [1] : vector<16x16xf32> to vector<16xf32>
    %99 = vector.shape_cast %98 : vector<16xf32> to vector<16x1xf32>
    %100 = vector.broadcast %99 : vector<16x1xf32> to vector<16x16xf32>
    %101 = arith.divf %97, %100 : vector<16x16xf32>
    %cst_49 = arith.constant dense<0.000000e+00> : vector<16x16xf32>
    %102 = tpu.matmul %101, %73, %cst_49 {dimension_numbers = #tpu.dot_dimension_numbers<[1], [0], [0], [1], [0, 0, 1, 1], [], []>} : vector<16x16xf32>, vector<16x16xf32>, vector<16x16xf32> -> vector<16x16xf32>
    %c0_50 = arith.constant 0 : index
    %c0_51 = arith.constant 0 : index
    %103 = vector.load %arg12[%c0_50, %c0_51] : memref<1x16xf32, #tpu.memory_space<vmem>>, vector<1x16xf32>
    %104 = vector.broadcast %103 : vector<1x16xf32> to vector<16x16xf32>
    %105 = arith.addf %102, %104 : vector<16x16xf32>
    %c0_52 = arith.constant 0 : index
    %c0_53 = arith.constant 0 : index
    %106 = vector.load %arg2[%c0_52, %c0_53] : memref<8x16xbf16, #tpu.memory_space<vmem>>, vector<8x16xbf16>
    %107 = arith.truncf %105 : vector<16x16xf32> to vector<16x16xbf16>
    %cst_54 = arith.constant dense<0.000000e+00> : vector<8x16xf32>
    %108 = tpu.matmul %106, %107, %cst_54 {dimension_numbers = #tpu.dot_dimension_numbers<[1], [0], [0], [1], [0, 0, 1, 1], [], []>} : vector<8x16xbf16>, vector<16x16xbf16>, vector<8x16xf32> -> vector<8x16xf32>
    %c0_55 = arith.constant 0 : index
    %c0_56 = arith.constant 0 : index
    %109 = vector.load %arg1[%c0_55, %c0_56] : memref<8x32xbf16, #tpu.memory_space<vmem>>, vector<8x32xbf16>
    %c0_57 = arith.constant 0 : index
    %c0_58 = arith.constant 0 : index
    %110 = vector.load %arg13[%c0_57, %c0_58] : memref<32x128xbf16, #tpu.memory_space<vmem>>, vector<32x128xbf16>
    %cst_59 = arith.constant dense<0.000000e+00> : vector<8x128xf32>
    %111 = tpu.matmul %109, %110, %cst_59 {dimension_numbers = #tpu.dot_dimension_numbers<[1], [0], [0], [1], [0, 0, 1, 1], [], []>} : vector<8x32xbf16>, vector<32x128xbf16>, vector<8x128xf32> -> vector<8x128xf32>
    %c0_60 = arith.constant 0 : index
    %c0_61 = arith.constant 0 : index
    %112 = vector.load %arg14[%c0_60, %c0_61] : memref<1x128xf32, #tpu.memory_space<vmem>>, vector<1x128xf32>
    %113 = vector.broadcast %112 : vector<1x128xf32> to vector<8x128xf32>
    %114 = arith.addf %111, %113 : vector<8x128xf32>
    %cst_62 = arith.constant 0.000000e+00 : f32
    %115 = vector.broadcast %cst_62 : f32 to vector<8x128xf32>
    %116 = arith.maximumf %114, %115 : vector<8x128xf32>
    %117 = arith.truncf %116 : vector<8x128xf32> to vector<8x128xbf16>
    %c0_63 = arith.constant 0 : index
    %c0_64 = arith.constant 0 : index
    %118 = vector.load %arg15[%c0_63, %c0_64] : memref<128x64xbf16, #tpu.memory_space<vmem>>, vector<128x64xbf16>
    %cst_65 = arith.constant dense<0.000000e+00> : vector<8x64xf32>
    %119 = tpu.matmul %117, %118, %cst_65 {dimension_numbers = #tpu.dot_dimension_numbers<[1], [0], [0], [1], [0, 0, 1, 1], [], []>} : vector<8x128xbf16>, vector<128x64xbf16>, vector<8x64xf32> -> vector<8x64xf32>
    %c0_66 = arith.constant 0 : index
    %c0_67 = arith.constant 0 : index
    %120 = vector.load %arg16[%c0_66, %c0_67] : memref<1x64xf32, #tpu.memory_space<vmem>>, vector<1x64xf32>
    %121 = vector.broadcast %120 : vector<1x64xf32> to vector<8x64xf32>
    %122 = arith.addf %119, %121 : vector<8x64xf32>
    %cst_68 = arith.constant 0.000000e+00 : f32
    %123 = vector.broadcast %cst_68 : f32 to vector<8x64xf32>
    %124 = arith.maximumf %122, %123 : vector<8x64xf32>
    %125 = arith.truncf %124 : vector<8x64xf32> to vector<8x64xbf16>
    %c0_69 = arith.constant 0 : index
    %c0_70 = arith.constant 0 : index
    %126 = vector.load %arg17[%c0_69, %c0_70] : memref<64x16xbf16, #tpu.memory_space<vmem>>, vector<64x16xbf16>
    %cst_71 = arith.constant dense<0.000000e+00> : vector<8x16xf32>
    %127 = tpu.matmul %125, %126, %cst_71 {dimension_numbers = #tpu.dot_dimension_numbers<[1], [0], [0], [1], [0, 0, 1, 1], [], []>} : vector<8x64xbf16>, vector<64x16xbf16>, vector<8x16xf32> -> vector<8x16xf32>
    %c0_72 = arith.constant 0 : index
    %c0_73 = arith.constant 0 : index
    %128 = vector.load %arg18[%c0_72, %c0_73] : memref<1x16xf32, #tpu.memory_space<vmem>>, vector<1x16xf32>
    %129 = vector.broadcast %128 : vector<1x16xf32> to vector<8x16xf32>
    %130 = arith.addf %127, %129 : vector<8x16xf32>
    %cst_74 = arith.constant 0.000000e+00 : f32
    %131 = vector.broadcast %cst_74 : f32 to vector<8x16xf32>
    %132 = arith.maximumf %130, %131 : vector<8x16xf32>
    %133 = arith.truncf %132 : vector<8x16xf32> to vector<8x16xbf16>
    %c0_75 = arith.constant 0 : index
    %c0_76 = arith.constant 0 : index
    %134 = vector.load %arg19[%c0_75, %c0_76] : memref<16x16xbf16, #tpu.memory_space<vmem>>, vector<16x16xbf16>
    %cst_77 = arith.constant dense<0.000000e+00> : vector<8x16xf32>
    %135 = tpu.matmul %133, %134, %cst_77 {dimension_numbers = #tpu.dot_dimension_numbers<[1], [0], [0], [1], [0, 0, 1, 1], [], []>} : vector<8x16xbf16>, vector<16x16xbf16>, vector<8x16xf32> -> vector<8x16xf32>
    %c0_78 = arith.constant 0 : index
    %c0_79 = arith.constant 0 : index
    %136 = vector.load %arg20[%c0_78, %c0_79] : memref<32x16xbf16, #tpu.memory_space<vmem>>, vector<32x16xbf16>
    %cst_80 = arith.constant dense<0.000000e+00> : vector<8x16xf32>
    %137 = tpu.matmul %109, %136, %cst_80 {dimension_numbers = #tpu.dot_dimension_numbers<[1], [0], [0], [1], [0, 0, 1, 1], [], []>} : vector<8x32xbf16>, vector<32x16xbf16>, vector<8x16xf32> -> vector<8x16xf32>
    %138 = arith.addf %135, %137 : vector<8x16xf32>
    %c0_81 = arith.constant 0 : index
    %c0_82 = arith.constant 0 : index
    %139 = vector.load %arg21[%c0_81, %c0_82] : memref<1x16xf32, #tpu.memory_space<vmem>>, vector<1x16xf32>
    %140 = vector.broadcast %139 : vector<1x16xf32> to vector<8x16xf32>
    %141 = arith.addf %138, %140 : vector<8x16xf32>
    %142 = arith.truncf %141 : vector<8x16xf32> to vector<8x16xbf16>
    %c0_83 = arith.constant 0 : index
    %c0_84 = arith.constant 0 : index
    %143 = vector.load %arg22[%c0_83, %c0_84] : memref<16x128xbf16, #tpu.memory_space<vmem>>, vector<16x128xbf16>
    %cst_85 = arith.constant dense<0.000000e+00> : vector<8x128xf32>
    %144 = tpu.matmul %142, %143, %cst_85 {dimension_numbers = #tpu.dot_dimension_numbers<[1], [0], [0], [1], [0, 0, 1, 1], [], []>} : vector<8x16xbf16>, vector<16x128xbf16>, vector<8x128xf32> -> vector<8x128xf32>
    %145 = arith.truncf %108 : vector<8x16xf32> to vector<8x16xbf16>
    %c0_86 = arith.constant 0 : index
    %c0_87 = arith.constant 0 : index
    %146 = vector.load %arg23[%c0_86, %c0_87] : memref<16x128xbf16, #tpu.memory_space<vmem>>, vector<16x128xbf16>
    %cst_88 = arith.constant dense<0.000000e+00> : vector<8x128xf32>
    %147 = tpu.matmul %145, %146, %cst_88 {dimension_numbers = #tpu.dot_dimension_numbers<[1], [0], [0], [1], [0, 0, 1, 1], [], []>} : vector<8x16xbf16>, vector<16x128xbf16>, vector<8x128xf32> -> vector<8x128xf32>
    %148 = arith.addf %144, %147 : vector<8x128xf32>
    %c0_89 = arith.constant 0 : index
    %c0_90 = arith.constant 0 : index
    %149 = vector.load %arg24[%c0_89, %c0_90] : memref<1x128xf32, #tpu.memory_space<vmem>>, vector<1x128xf32>
    %150 = vector.broadcast %149 : vector<1x128xf32> to vector<8x128xf32>
    %151 = arith.addf %148, %150 : vector<8x128xf32>
    %cst_91 = arith.constant dense<0xFF800000> : vector<8xf32>
    %152 = vector.multi_reduction <maximumf>, %151, %cst_91 [1] : vector<8x128xf32> to vector<8xf32>
    %153 = vector.shape_cast %152 : vector<8xf32> to vector<8x1xf32>
    %154 = vector.broadcast %153 : vector<8x1xf32> to vector<8x128xf32>
    %155 = arith.subf %151, %154 : vector<8x128xf32>
    %156 = math.exp %155 : vector<8x128xf32>
    %cst_92 = arith.constant dense<0.000000e+00> : vector<8xf32>
    %157 = vector.multi_reduction <add>, %156, %cst_92 [1] : vector<8x128xf32> to vector<8xf32>
    %158 = vector.shape_cast %157 : vector<8xf32> to vector<8x1xf32>
    %159 = math.log %158 : vector<8x1xf32>
    %160 = vector.broadcast %159 : vector<8x1xf32> to vector<8x128xf32>
    %161 = arith.subf %155, %160 : vector<8x128xf32>
    %162 = arith.truncf %161 : vector<8x128xf32> to vector<8x128xbf16>
    %c0_93 = arith.constant 0 : index
    %c0_94 = arith.constant 0 : index
    %163 = vector.load %arg25[%c0_93, %c0_94] : memref<8x128xbf16, #tpu.memory_space<vmem>>, vector<8x128xbf16>
    tpu.vector_store %arg25[%c0_93, %c0_94], %162 {strides = array<i32>} : memref<8x128xbf16, #tpu.memory_space<vmem>>, vector<8x128xbf16>,
    return
  }
  func.func @transform_0(%arg0: i32) -> (i32, i32) {
    %c0_i32 = arith.constant 0 : i32
    %c0_i32_0 = arith.constant 0 : i32
    return %arg0, %c0_i32 : i32, i32
  }
  func.func @transform_1(%arg0: i32) -> (i32, i32) {
    %c0_i32 = arith.constant 0 : i32
    %c0_i32_0 = arith.constant 0 : i32
    return %arg0, %c0_i32 : i32, i32
  }
  func.func @transform_2(%arg0: i32) -> (i32, i32) {
    %c0_i32 = arith.constant 0 : i32
    %c0_i32_0 = arith.constant 0 : i32
    %c0_i32_1 = arith.constant 0 : i32
    return %c0_i32, %c0_i32_0 : i32, i32
  }
  func.func @transform_3(%arg0: i32) -> (i32, i32) {
    %c0_i32 = arith.constant 0 : i32
    %c0_i32_0 = arith.constant 0 : i32
    %c0_i32_1 = arith.constant 0 : i32
    return %c0_i32, %c0_i32_0 : i32, i32
  }
  func.func @transform_4(%arg0: i32) -> (i32, i32) {
    %c0_i32 = arith.constant 0 : i32
    %c0_i32_0 = arith.constant 0 : i32
    %c0_i32_1 = arith.constant 0 : i32
    return %c0_i32, %c0_i32_0 : i32, i32
  }
  func.func @transform_5(%arg0: i32) -> (i32, i32) {
    %c0_i32 = arith.constant 0 : i32
    %c0_i32_0 = arith.constant 0 : i32
    %c0_i32_1 = arith.constant 0 : i32
    return %c0_i32, %c0_i32_0 : i32, i32
  }
  func.func @transform_6(%arg0: i32) -> (i32, i32) {
    %c0_i32 = arith.constant 0 : i32
    %c0_i32_0 = arith.constant 0 : i32
    %c0_i32_1 = arith.constant 0 : i32
    return %c0_i32, %c0_i32_0 : i32, i32
  }
  func.func @transform_7(%arg0: i32) -> (i32, i32) {
    %c0_i32 = arith.constant 0 : i32
    %c0_i32_0 = arith.constant 0 : i32
    %c0_i32_1 = arith.constant 0 : i32
    return %c0_i32, %c0_i32_0 : i32, i32
  }
  func.func @transform_8(%arg0: i32) -> (i32, i32) {
    %c0_i32 = arith.constant 0 : i32
    %c0_i32_0 = arith.constant 0 : i32
    %c0_i32_1 = arith.constant 0 : i32
    return %c0_i32, %c0_i32_0 : i32, i32
  }
  func.func @transform_9(%arg0: i32) -> (i32, i32) {
    %c0_i32 = arith.constant 0 : i32
    %c0_i32_0 = arith.constant 0 : i32
    %c0_i32_1 = arith.constant 0 : i32
    return %c0_i32, %c0_i32_0 : i32, i32
  }
  func.func @transform_10(%arg0: i32) -> (i32, i32) {
    %c0_i32 = arith.constant 0 : i32
    %c0_i32_0 = arith.constant 0 : i32
    %c0_i32_1 = arith.constant 0 : i32
    return %c0_i32, %c0_i32_0 : i32, i32
  }
  func.func @transform_11(%arg0: i32) -> (i32, i32) {
    %c0_i32 = arith.constant 0 : i32
    %c0_i32_0 = arith.constant 0 : i32
    %c0_i32_1 = arith.constant 0 : i32
    return %c0_i32, %c0_i32_0 : i32, i32
  }
  func.func @transform_12(%arg0: i32) -> (i32, i32) {
    %c0_i32 = arith.constant 0 : i32
    %c0_i32_0 = arith.constant 0 : i32
    %c0_i32_1 = arith.constant 0 : i32
    return %c0_i32, %c0_i32_0 : i32, i32
  }
  func.func @transform_13(%arg0: i32) -> (i32, i32) {
    %c0_i32 = arith.constant 0 : i32
    %c0_i32_0 = arith.constant 0 : i32
    %c0_i32_1 = arith.constant 0 : i32
    return %c0_i32, %c0_i32_0 : i32, i32
  }
  func.func @transform_14(%arg0: i32) -> (i32, i32) {
    %c0_i32 = arith.constant 0 : i32
    %c0_i32_0 = arith.constant 0 : i32
    %c0_i32_1 = arith.constant 0 : i32
    return %c0_i32, %c0_i32_0 : i32, i32
  }
  func.func @transform_15(%arg0: i32) -> (i32, i32) {
    %c0_i32 = arith.constant 0 : i32
    %c0_i32_0 = arith.constant 0 : i32
    %c0_i32_1 = arith.constant 0 : i32
    return %c0_i32, %c0_i32_0 : i32, i32
  }
  func.func @transform_16(%arg0: i32) -> (i32, i32) {
    %c0_i32 = arith.constant 0 : i32
    %c0_i32_0 = arith.constant 0 : i32
    %c0_i32_1 = arith.constant 0 : i32
    return %c0_i32, %c0_i32_0 : i32, i32
  }
  func.func @transform_17(%arg0: i32) -> (i32, i32) {
    %c0_i32 = arith.constant 0 : i32
    %c0_i32_0 = arith.constant 0 : i32
    %c0_i32_1 = arith.constant 0 : i32
    return %c0_i32, %c0_i32_0 : i32, i32
  }
  func.func @transform_18(%arg0: i32) -> (i32, i32) {
    %c0_i32 = arith.constant 0 : i32
    %c0_i32_0 = arith.constant 0 : i32
    %c0_i32_1 = arith.constant 0 : i32
    return %c0_i32, %c0_i32_0 : i32, i32
  }
  func.func @transform_19(%arg0: i32) -> (i32, i32) {
    %c0_i32 = arith.constant 0 : i32
    %c0_i32_0 = arith.constant 0 : i32
    %c0_i32_1 = arith.constant 0 : i32
    return %c0_i32, %c0_i32_0 : i32, i32
  }
  func.func @transform_20(%arg0: i32) -> (i32, i32) {
    %c0_i32 = arith.constant 0 : i32
    %c0_i32_0 = arith.constant 0 : i32
    %c0_i32_1 = arith.constant 0 : i32
    return %c0_i32, %c0_i32_0 : i32, i32
  }
  func.func @transform_21(%arg0: i32) -> (i32, i32) {
    %c0_i32 = arith.constant 0 : i32
    %c0_i32_0 = arith.constant 0 : i32
    %c0_i32_1 = arith.constant 0 : i32
    return %c0_i32, %c0_i32_0 : i32, i32
  }
  func.func @transform_22(%arg0: i32) -> (i32, i32) {
    %c0_i32 = arith.constant 0 : i32
    %c0_i32_0 = arith.constant 0 : i32
    %c0_i32_1 = arith.constant 0 : i32
    return %c0_i32, %c0_i32_0 : i32, i32
  }
  func.func @transform_23(%arg0: i32) -> (i32, i32) {
    %c0_i32 = arith.constant 0 : i32
    %c0_i32_0 = arith.constant 0 : i32
    %c0_i32_1 = arith.constant 0 : i32
    return %c0_i32, %c0_i32_0 : i32, i32
  }
  func.func @transform_24(%arg0: i32) -> (i32, i32) {
    %c0_i32 = arith.constant 0 : i32
    %c0_i32_0 = arith.constant 0 : i32
    return %arg0, %c0_i32 : i32, i32
  }
}

</mosaic_0001>

<bundles_post_ra>
// kernel: tpu_custom_call.1
= control target key start
LH: loop header
LB: loop body
LE: loop exit
PB: predicated region body
PF: predicated region fallthrough
CT: control target
= control target key end

     0   :  { %s1475_s0 = inlined_call_operand.vmem [shape: bf16[8,32], index: 0, kind: input, shape index: {}]   ;;  %s1476_s1 = inlined_call_operand.vmem [shape: bf16[8,16], index: 1, kind: input, shape index: {}]   ;;  %s1477_s2 = inlined_call_operand.vmem [shape: f32[16,16], index: 2, kind: input, shape index: {}]   ;;  %s1478_s3 = inlined_call_operand.vmem [shape: f32[16,16], index: 3, kind: input, shape index: {}]   ;;  %s1479_s4 = inlined_call_operand.vmem [shape: f32[16,64], index: 4, kind: input, shape index: {}]   ;;  %s1480_s5 = inlined_call_operand.vmem [shape: f32[2,32], index: 5, kind: input, shape index: {}]   ;;  %s1481_s6 = inlined_call_operand.vmem [shape: f32[2,32], index: 6, kind: input, shape index: {}]   ;;  %s1482_s7 = inlined_call_operand.vmem [shape: f32[1,64], index: 7, kind: input, shape index: {}]   ;;  %s1483_s8 = inlined_call_operand.vmem [shape: f32[64,16], index: 8, kind: input, shape index: {}]   ;;  %s1484_s9 = inlined_call_operand.vmem [shape: f32[1,16], index: 9, kind: input, shape index: {}]   ;;  %s1485_s10 = inlined_call_operand.vmem [shape: f32[1,16], index: 10, kind: input, shape index: {}]   ;;  %s1486_s11 = inlined_call_operand.vmem [shape: f32[1,16], index: 11, kind: input, shape index: {}]   ;;  %s1487_s12 = inlined_call_operand.vmem [shape: bf16[32,128], index: 12, kind: input, shape index: {}]   ;;  %s1488_s13 = inlined_call_operand.vmem [shape: f32[1,128], index: 13, kind: input, shape index: {}]   ;;  %s1489_s14 = inlined_call_operand.vmem [shape: bf16[128,64], index: 14, kind: input, shape index: {}]   ;;  %s1490_s15 = inlined_call_operand.vmem [shape: f32[1,64], index: 15, kind: input, shape index: {}]   ;;  %s1491_s16 = inlined_call_operand.vmem [shape: bf16[64,16], index: 16, kind: input, shape index: {}]   ;;  %s1492_s17 = inlined_call_operand.vmem [shape: f32[1,16], index: 17, kind: input, shape index: {}]   ;;  %s1493_s18 = inlined_call_operand.vmem [shape: bf16[16,16], index: 18, kind: input, shape index: {}]   ;;  %s1494_s19 = inlined_call_operand.vmem [shape: bf16[32,16], index: 19, kind: input, shape index: {}]   ;;  %s1495_s20 = inlined_call_operand.vmem [shape: f32[1,16], index: 20, kind: input, shape index: {}]   ;;  %s1496_s21 = inlined_call_operand.vmem [shape: bf16[16,128], index: 21, kind: input, shape index: {}]   ;;  %s1497_s22 = inlined_call_operand.vmem [shape: bf16[16,128], index: 22, kind: input, shape index: {}]   ;;  %s1498_s23 = inlined_call_operand.vmem [shape: f32[1,128], index: 23, kind: input, shape index: {}]   ;;  %s1499_s24 = inlined_call_operand.hbm [shape: bf16[8,128], index: 24, kind: output, shape index: {}]  }
   0x1   :  { %1506 = sst [smem:[#allocation5_spill]] %s1475_s0 }
   0x2   :  { %1507 = sst [smem:[#allocation6_spill]] %s1476_s1 }
   0x3   :  { %1508 = sst [smem:[#allocation7_spill]] %s1477_s2 }
   0x4   :  { %1509 = sst [smem:[#allocation8_spill]] %s1478_s3 }
   0x5   :  { %1510 = sst [smem:[#allocation9_spill]] %s1479_s4 }
   0x6   :  { %1511 = sst [smem:[#allocation10_spill]] %s1480_s5 }
   0x7   :  { %1512 = sst [smem:[#allocation11_spill]] %s1481_s6 }
   0x8   :  { %1513 = sst [smem:[#allocation12_spill]] %s1482_s7 }
   0x9   :  { %1514 = sst [smem:[#allocation13_spill]] %s1483_s8 }
   0xa   :  { %s1515_s27 = sld [smem:[#allocation9_spill]]  ;;  %vm87_vm0 = vcmask 130048   ;;  %s1109_s25 = smov 32  }
   0xb   :  { %s1516_s0 = sld [smem:[#allocation7_spill]] }
   0xc   :  { %s1517_s3 = sld [smem:[#allocation11_spill]] }
  0x10   :  { %v86_v0 = vld [vmem:[%s1515_s27 + $0x8] sm:$0xff]  ;;  %v85_v1 = vld [vmem:[%s1515_s27] sm:$0xff] }
  0x11   :  { %108 = vmatpush.msra.mxu0 %v86_v0  ;;  %v83_v2 = vld [vmem:[%s1516_s0] sm:$0xff] }
  0x12   :  { %v1045_v3 = vld [vmem:[%s1517_s3 + $0x1] ss:$0 sm:$0xff] }
  0x13   :  { %109 = vmatpush.msra.mxu0 %v85_v1  ;;  %252 = vrot.lane.b32.xlu1 %v1045_v3, %s1109_s25 }
  0x14   :  { %921 = vmatmul.msk.f32.vlgmr.msra.gmra.mxu0 %vm87_vm0, %v83_v2 }
  0x15   :  { %29 = vsyncpa [#allocation3], 0  ;;  %v84_v4 = vld [vmem:[%s1516_s0 + $0x8] sm:$0xff]  ;;  %s1110_s1 = smov 96   ;;  %vm122_vm1 = vcmask 261120   ;;  %s1518_s27 = sld [smem:[#allocation10_spill]] }
  0x16   :  { %v1046_v11 = vld [vmem:[%s1517_s3] ss:$0 sm:$0xff]  ;;  %s1519_s30 = sld [smem:[#allocation8_spill]] }
  0x17   :  { %s1520_s5 = sld [smem:[#allocation13_spill]] }
  0x18   :  { %s1521_s28 = sld [smem:[#allocation12_spill]] }
  0x19   :  { %s1522_s8 = sld [smem:[#allocation5_spill]] }
  0x1a   :  { %s1523_s7 = sld [smem:[#allocation6_spill]] }
  0x1b   :  { %v117_v10 = vld [vmem:[%s1518_s27] sm:$0x1]  ;;  %v248_v22 = vld [vmem:[%s1518_s27 + $0x1] sm:$0x1] }
  0x1c   :  { %922 = vmatmul.msk.f32.gmra.mxu0 %vm87_vm0, %v84_v4  ;;  %v1277_v26 = vld [vmem:[%s1519_s30] sm:$0xff]  ;;  %v1286_v40 = vld [vmem:[%s1519_s30 + $0x8] sm:$0xff] }
  0x1d   :  { %vm81_vm2 = vcmp.gt.f32.partialorder %v1277_v26, 0.0  ;;  %vm82_vm6 = vcmp.gt.f32.partialorder %v1286_v40, 0.0  ;;  %v1034_v26 = vld [vmem:[%s1491_s16 + $0x8] sm:$0xff] }
  0x85   :  { %v253_v5 = vpop.permute.xlu1 %252 }
  0x91   :  { %v111_v6 = vpop.f32.mrf.mxu0 }
  0x92   :  { %v255_v7 = vmul.f32 %v253_v5, %v111_v6  ;;  %v120_v12 = vmul.f32 %v1046_v11, %v111_v6 }
  0x94   :  { %259 = vrot.lane.b32.xlu1 %v255_v7, %s1110_s1  ;;  %v123_v13 = vsel %vm122_vm1, %v120_v12, 0.0 }
  0x99   :  { %v114_v8 = vpop.f32.mrf.mxu0 }
  0x9a   :  { %273 = vrot.lane.b32.xlu0 %v114_v8, %s1110_s1  ;;  %923 = vmatpush.xpose.msk.msra.mxu1 %vm122_vm1, %v114_v8  ;;  %v256_v9 = vmul.f32 %v253_v5, %v114_v8  ;;  %v121_v18 = vmul.f32 %v1046_v11, %v114_v8 }
  0x9b   :  { %239 = vmatpush.msra.mxu2 %v114_v8 }
  0x9c   :  { %261 = vrot.lane.b32.xlu2 %v256_v9, %s1110_s1  ;;  %v126_v20 = vsel %vm122_vm1, %v121_v18, 0.0 }
  0x9d   :  { %240 = vmatpush.msra.mxu2 %v111_v6 }
  0x9e   :  { %924 = vmatpush.xpose.msk.msra.mxu1 %vm122_vm1, %v111_v6 }
  0xa1   :  { %925 = vmatmul.msk.f32.vlgmr.msra.gmra.mxu1 %vm122_vm1, %v117_v10 }
  0xa2   :  { %271 = vrot.lane.b32.xlu0 %v111_v6, %s1110_s1 }
  0xbe   :  { %124 = vadd.xlane.f32.xlu1 %v123_v13 }
  0xf6   :  { %v262_v14 = vpop.permute.xlu2 %261 }
  0xf7   :  { %v268_v15 = vsel %vm122_vm1, %v262_v14, 0.0 }
  0xf8   :  { %269 = vadd.xlane.f32.xlu0 %v268_v15 }
 0x106   :  { %v260_v16 = vpop.permute.xlu1 %259 }
 0x107   :  { %v265_v17 = vsel %vm122_vm1, %v260_v16, 0.0 }
 0x108   :  { %266 = vadd.xlane.f32.xlu2 %v265_v17 }
 0x10c   :  { %v274_v19 = vpop.permute.xlu0 %273 }
 0x10d   :  { %928 = vmatpush.xpose.msk.msra.mxu3 %vm122_vm1, %v274_v19  ;;  %385 = vmatpush.msrb.mxu1 %v274_v19 }
 0x110   :  { %127 = vadd.xlane.f32.xlu2 %v126_v20 }
 0x114   :  { %v272_v21 = vpop.permute.xlu0 %271 }
 0x115   :  { %929 = vmatpush.xpose.msk.msra.mxu3 %vm122_vm1, %v272_v21  ;;  %386 = vmatpush.msrb.mxu1 %v272_v21 }
 0x118   :  { %930 = vmatmul.msk.f32.vlgmr.msra.gmra.mxu3 %vm122_vm1, %v248_v22 }
 0x11e   :  { %v155_v23 = vpop.f32.mrf.mxu1 }
 0x11f   :  { %v158_v24 = vperm.slane %v155_v23, 0 }
 0x131   :  { %v125_v25 = vpop.xlane.xlu1 %124 }
 0x132   :  { %v159_v27 = vadd.f32 %v158_v24, %v125_v25 }
 0x134   :  { %v163_v28 = vmul.f32 0.2, %v159_v27  ;;  %vm161_vm3 = vcmp.ge.f32.partialorder %v159_v27, 0.0 }
 0x136   :  { %v165_v29 = vsel %vm161_vm3, %v159_v27, %v163_v28 }
 0x137   :  { %v167_v30 = vsel %vm81_vm2, %v165_v29, -1e+30 }
 0x138   :  { %v169_v31 = vsel %vm87_vm0, %v167_v30, -inf }
 0x139   :  { %170 = vmax.xlane.f32.xlu1 %v169_v31 }
 0x16b   :  { %v270_v36 = vpop.xlane.xlu0 %269 }
 0x17b   :  { %v267_v32 = vpop.xlane.xlu2 %266 }
 0x183   :  { %v128_v33 = vpop.xlane.xlu2 %127 }
 0x184   :  { %v160_v37 = vadd.f32 %v158_v24, %v128_v33 }
 0x186   :  { %v164_v43 = vmul.f32 0.2, %v160_v37  ;;  %vm162_vm7 = vcmp.ge.f32.partialorder %v160_v37, 0.0 }
 0x188   :  { %v166_v50 = vsel %vm162_vm7, %v160_v37, %v164_v43 }
 0x189   :  { %v168_v51 = vsel %vm82_vm6, %v166_v50, -1e+30 }
 0x18a   :  { %v172_v53 = vsel %vm87_vm0, %v168_v51, -inf }
 0x19b   :  { %v299_v34 = vpop.f32.mrf.mxu3 }
 0x19c   :  { %v302_v35 = vperm.slane %v299_v34, 0 }
 0x19e   :  { %v303_v38 = vadd.f32 %v302_v35, %v267_v32  ;;  %v304_v39 = vadd.f32 %v302_v35, %v270_v36 }
 0x1a0   :  { %vm306_vm4 = vcmp.ge.f32.partialorder %v304_v39, 0.0  ;;  %v308_v41 = vmul.f32 0.2, %v304_v39  ;;  %vm305_vm5 = vcmp.ge.f32.partialorder %v303_v38, 0.0  ;;  %v307_v42 = vmul.f32 0.2, %v303_v38 }
 0x1a2   :  { %v310_v44 = vsel %vm306_vm4, %v304_v39, %v308_v41  ;;  %v309_v45 = vsel %vm305_vm5, %v303_v38, %v307_v42 }
 0x1a3   :  { %v312_v46 = vsel %vm82_vm6, %v310_v44, -1e+30  ;;  %v311_v47 = vsel %vm81_vm2, %v309_v45, -1e+30 }
 0x1a4   :  { %v316_v48 = vsel %vm87_vm0, %v312_v46, -inf  ;;  %v313_v49 = vsel %vm87_vm0, %v311_v47, -inf }
 0x1a5   :  { %317 = vmax.xlane.f32.xlu0 %v316_v48  ;;  %314 = vmax.xlane.f32.xlu2 %v313_v49 }
 0x1ac   :  { %v171_v52 = vpop.xlane.xlu1 %170 }
 0x1ad   :  { %v175_v54 = vsub.f32 %v167_v30, %v171_v52  ;;  %173 = vmax.xlane.f32.xlu2 %v172_v53 }
 0x1af   :  { %v177_v55 = vmul.f32 1.442695, %v175_v54 }
 0x1b1   :  { %1055 = vpow2.f32 %v177_v55 }
 0x1b7   :  { %v1056_v56 = vpop.eup %1055 }
 0x1b8   :  { %v181_v57 = vsel %vm81_vm2, %v1056_v56, 0.0 }
 0x1b9   :  { %v183_v58 = vsel %vm87_vm0, %v181_v57, 0.0 }
 0x1ba   :  { %184 = vadd.xlane.f32.xlu2 %v183_v58 }
 0x218   :  { %v318_v59 = vpop.xlane.xlu0 %317  ;;  %v315_v60 = vpop.xlane.xlu2 %314 }
 0x219   :  { %v320_v61 = vsub.f32 %v312_v46, %v318_v59  ;;  %v319_v62 = vsub.f32 %v311_v47, %v315_v60 }
 0x21b   :  { %v323_v63 = vmul.f32 1.442695, %v320_v61  ;;  %v321_v0 = vmul.f32 1.442695, %v319_v62 }
 0x21d   :  { %1057 = vpow2.f32 %v323_v63 }
 0x21e   :  { %1059 = vpow2.f32 %v321_v0 }
 0x220   :  { %v174_v1 = vpop.xlane.xlu2 %173 }
 0x221   :  { %v176_v2 = vsub.f32 %v168_v51, %v174_v1  ;;  %v419_v1 = vld [vmem:[%s1520_s5 + $0x38] sm:$0xff] }
 0x222   :  { %435 = vmatpush.msrb.mxu0 %v419_v1 }
 0x223   :  { %v1058_v3 = vpop.eup %1057  ;;  %v179_v4 = vmul.f32 1.442695, %v176_v2  ;;  %v418_v2 = vld [vmem:[%s1520_s5 + $0x30] sm:$0xff] }
 0x224   :  { %v1060_v5 = vpop.eup %1059  ;;  %v1303_v6 = vsel %vm82_vm6, %v1058_v3, 0.0  ;;  %v417_v3 = vld [vmem:[%s1520_s5 + $0x28] sm:$0xff]  ;;  %436 = vmatpush.msrb.mxu0 %v418_v2 }
 0x225   :  { %1061 = vpow2.f32 %v179_v4  ;;  %v325_v7 = vsel %vm81_vm2, %v1060_v5, 0.0  ;;  %v330_v8 = vsel %vm87_vm0, %v1303_v6, 0.0  ;;  %v416_v4 = vld [vmem:[%s1520_s5 + $0x20] sm:$0xff]  ;;  %v415_v5 = vld [vmem:[%s1520_s5 + $0x18] sm:$0xff] }
 0x226   :  { %v327_v9 = vsel %vm87_vm0, %v325_v7, 0.0  ;;  %331 = vadd.xlane.f32.xlu1 %v330_v8  ;;  %437 = vmatpush.msrb.mxu0 %v417_v3  ;;  %v412_v8 = vld [vmem:[%s1520_s5] sm:$0xff] }
 0x227   :  { %328 = vadd.xlane.f32.xlu0 %v327_v9 }
 0x228   :  { %438 = vmatpush.msrb.mxu0 %v416_v4 }
 0x22a   :  { %439 = vmatpush.msrb.mxu0 %v415_v5 }
 0x22b   :  { %v1062_v10 = vpop.eup %1061 }
 0x22c   :  { %v1312_v11 = vsel %vm82_vm6, %v1062_v10, 0.0  ;;  %v1047_v10 = vld [vmem:[%s1521_s28] ss:$0 sm:$0xff] }
 0x22d   :  { %v185_v12 = vpop.xlane.xlu2 %184  ;;  %v186_v13 = vsel %vm87_vm0, %v1312_v11, 0.0 }
 0x22e   :  { %1063 = vrcp.f32 %v185_v12  ;;  %v200_v17 = vand.u32 2147483648, %v185_v12  ;;  %v198_v19 = vand.u32 2147483647, %v185_v12  ;;  %vm194_vm9 = vweird.f32 %v185_v12 }
 0x22f   :  { %187 = vadd.xlane.f32.xlu0 %v186_v13 }
 0x230   :  { %v201_v21 = vor.u32 1.1754944e-38, %v200_v17  ;;  %vm199_vm11 = vcmp.eq.f32.partialorder %v198_v19, 8.507059e+37 }
 0x234   :  { %v1064_v14 = vpop.eup %1063 }
 0x235   :  { %v190_v15 = vmul.f32 %v1064_v14, %v185_v12  ;;  %vm195_vm8 = vweird.f32 %v1064_v14 }
 0x236   :  { %vm196_vm10 = vmor %vm194_vm9, %vm195_vm8 }
 0x237   :  { %v191_v16 = vsub.f32 1.0, %v190_v15 }
 0x239   :  { %v192_v18 = vmul.f32 %v1064_v14, %v191_v16 }
 0x23b   :  { %v193_v20 = vadd.f32 %v1064_v14, %v192_v18 }
 0x23d   :  { %v197_v22 = vsel %vm196_vm10, %v1064_v14, %v193_v20  ;;  %v1048_v20 = vld [vmem:[%s1485_s10] ss:$0 sm:$0xff] }
 0x23e   :  { %v202_v23 = vsel %vm199_vm11, %v201_v21, %v197_v22 }
 0x23f   :  { %v203_v24 = vmul.f32 %v202_v23, %v181_v57 }
 0x241   :  { %926 = vmatmul.msk.f32.vlgmr.msra.gmra.mxu2 %vm87_vm0, %v203_v24 }
 0x299   :  { %v332_v25 = vpop.xlane.xlu1 %331 }
 0x29a   :  { %v329_v27 = vpop.xlane.xlu0 %328  ;;  %1065 = vrcp.f32 %v332_v25  ;;  %v359_v46 = vand.u32 2147483648, %v332_v25  ;;  %vm353_vm4 = vweird.f32 %v332_v25  ;;  %v357_v50 = vand.u32 2147483647, %v332_v25 }
 0x29b   :  { %1067 = vrcp.f32 %v329_v27  ;;  %v342_v35 = vand.u32 2147483647, %v329_v27  ;;  %v344_v36 = vand.u32 2147483648, %v329_v27  ;;  %vm338_vm13 = vweird.f32 %v329_v27 }
 0x29c   :  { %v360_v55 = vor.u32 1.1754944e-38, %v359_v46  ;;  %vm358_vm9 = vcmp.eq.f32.partialorder %v357_v50, 8.507059e+37  ;;  %v1029_v50 = vld [vmem:[%s1489_s14 + $0x20] sm:$0xff] }
 0x29d   :  { %vm343_vm15 = vcmp.eq.f32.partialorder %v342_v35, 8.507059e+37  ;;  %v345_v42 = vor.u32 1.1754944e-38, %v344_v36 }
 0x2a0   :  { %v1066_v28 = vpop.eup %1065 }
 0x2a1   :  { %v1068_v29 = vpop.eup %1067  ;;  %v349_v30 = vmul.f32 %v1066_v28, %v332_v25  ;;  %vm354_vm3 = vweird.f32 %v1066_v28 }
 0x2a2   :  { %v334_v31 = vmul.f32 %v1068_v29, %v329_v27  ;;  %v188_v32 = vpop.xlane.xlu0 %187  ;;  %vm339_vm12 = vweird.f32 %v1068_v29  ;;  %vm355_vm5 = vmor %vm353_vm4, %vm354_vm3 }
 0x2a3   :  { %v350_v33 = vsub.f32 1.0, %v349_v30  ;;  %1069 = vrcp.f32 %v188_v32  ;;  %vm340_vm14 = vmor %vm338_vm13, %vm339_vm12  ;;  %v215_v51 = vand.u32 2147483648, %v188_v32  ;;  %v213_v53 = vand.u32 2147483647, %v188_v32  ;;  %v1023_v30 = vld [vmem:[%s1487_s12] sm:$0xff] }
 0x2a4   :  { %v335_v34 = vsub.f32 1.0, %v334_v31  ;;  %vm209_vm8 = vweird.f32 %v188_v32  ;;  %vm420_vm12 = vcmask 523264   ;;  %v1375_v31 = vld [vmem:[%s1522_s8] sm:$0xf] }
 0x2a5   :  { %v351_v38 = vmul.f32 %v1066_v28, %v350_v33  ;;  %v216_v57 = vor.u32 1.1754944e-38, %v215_v51  ;;  %vm214_vm11 = vcmp.eq.f32.partialorder %v213_v53, 8.507059e+37  ;;  %v1049_v53 = vld [vmem:[%s1488_s13] ss:$0 sm:$0xff] }
 0x2a6   :  { %v336_v37 = vmul.f32 %v1068_v29, %v335_v34 }
 0x2a7   :  { %v352_v45 = vadd.f32 %v1066_v28, %v351_v38 }
 0x2a8   :  { %v337_v39 = vadd.f32 %v1068_v29, %v336_v37 }
 0x2a9   :  { %v1070_v41 = vpop.eup %1069  ;;  %v356_v54 = vsel %vm355_vm5, %v1066_v28, %v352_v45  ;;  %v450_v28 = vld [vmem:[%s1484_s9] sm:$0x1] }
 0x2aa   :  { %v205_v43 = vmul.f32 %v1070_v41, %v188_v32  ;;  %v341_v44 = vsel %vm340_vm14, %v1068_v29, %v337_v39  ;;  %vm210_vm7 = vweird.f32 %v1070_v41  ;;  %v361_v58 = vsel %vm358_vm9, %v360_v55, %v356_v54  ;;  %v1024_v29 = vld [vmem:[%s1487_s12 + $0x8] sm:$0xff]  ;;  %v1027_v54 = vld [vmem:[%s1489_s14 + $0x10] sm:$0xff] }
 0x2ab   :  { %v346_v47 = vsel %vm343_vm15, %v345_v42, %v341_v44  ;;  %vm211_vm10 = vmor %vm209_vm8, %vm210_vm7  ;;  %v362_v62 = vmul.f32 %v361_v58, %v1303_v6  ;;  %v414_v6 = vld [vmem:[%s1520_s5 + $0x10] sm:$0xff]  ;;  %634 = vmatpush.bf16.msra.mxu1 %v1024_v29 }
 0x2ac   :  { %v206_v48 = vsub.f32 1.0, %v205_v43  ;;  %v347_v49 = vmul.f32 %v346_v47, %v325_v7  ;;  %440 = vmatpush.msrb.mxu0 %v414_v6  ;;  %v413_v7 = vld [vmem:[%s1520_s5 + $0x8] sm:$0xff]  ;;  %v1032_v47 = vld [vmem:[%s1489_s14 + $0x38] sm:$0xff] }
 0x2ae   :  { %v207_v52 = vmul.f32 %v1070_v41, %v206_v48  ;;  %931 = vmatmul.msk.f32.vlgmr.msrb.gmra.mxu1 %vm87_vm0, %v347_v49  ;;  %441 = vmatpush.msrb.mxu0 %v413_v7  ;;  %v1031_v48 = vld [vmem:[%s1489_s14 + $0x30] sm:$0xff]  ;;  %v1030_v49 = vld [vmem:[%s1489_s14 + $0x28] sm:$0xff] }
 0x2af   :  { %635 = vmatpush.bf16.msra.mxu1 %v1023_v30 }
 0x2b0   :  { %v208_v56 = vadd.f32 %v1070_v41, %v207_v52  ;;  %442 = vmatpush.msrb.mxu0 %v412_v8  ;;  %v1028_v52 = vld [vmem:[%s1489_s14 + $0x18] sm:$0xff] }
 0x2b2   :  { %v212_v59 = vsel %vm211_vm10, %v1070_v41, %v208_v56  ;;  %711 = vmatpush.bf16.msra.mxu0 %v1032_v47 }
 0x2b3   :  { %v217_v60 = vsel %vm214_vm11, %v216_v57, %v212_v59  ;;  %v1026_v57 = vld [vmem:[%s1489_s14 + $0x8] sm:$0xff] }
 0x2b4   :  { %v218_v61 = vmul.f32 %v217_v60, %v1312_v11 }
 0x2b6   :  { %927 = vmatmul.msk.f32.gmra.mxu2 %vm87_vm0, %v218_v61  ;;  %932 = vmatmul.msk.f32.gmra.mxu1 %vm87_vm0, %v362_v62 }
 0x2b7   :  { %712 = vmatpush.bf16.msra.mxu0 %v1031_v48 }
 0x2bb   :  { %713 = vmatpush.bf16.msra.mxu0 %v1030_v49 }
 0x2be   :  { %949 = vmatmul.msk.bf16.vlgmr.msra.gmra.mxu1 %vm122_vm1, %v1375_v31 }
 0x2bf   :  { %714 = vmatpush.bf16.msra.mxu0 %v1029_v50  ;;  %v1039_v50 = vld [vmem:[%s1494_s19 + $0x8] sm:$0xff] }
 0x2c3   :  { %715 = vmatpush.bf16.msra.mxu0 %v1028_v52  ;;  %v586_v52 = vld [vmem:[%s1523_s7] sm:$0xf] }
 0x2c4   :  { %v242_v9 = vpop.f32.mrf.mxu2 }
 0x2c7   :  { %716 = vmatpush.bf16.msra.mxu0 %v1027_v54  ;;  %v1038_v54 = vld [vmem:[%s1494_s19] sm:$0xff] }
 0x2cb   :  { %717 = vmatpush.bf16.msra.mxu0 %v1026_v57 }
 0x32b   :  { %v388_v63 = vpop.f32.mrf.mxu1 }
 0x32c   :  { %396 = vrot.lane.b32.xlu1 %v388_v63, %s1109_s25  ;;  %v1025_v63 = vld [vmem:[%s1489_s14] sm:$0xff] }
 0x32d   :  { %718 = vmatpush.bf16.msra.mxu0 %v1025_v63 }
 0x333   :  { %v391_v0 = vpop.f32.mrf.mxu1 }
 0x334   :  { %398 = vrot.lane.b32.xlu2 %v391_v0, %s1109_s25 }
 0x339   :  { %v245_v15 = vpop.f32.mrf.mxu2 }
 0x33b   :  { %v637_v51 = vpop.f32.mrf.mxu1 }
 0x33c   :  { %v638_v56 = vadd.f32 %v1049_v53, %v637_v51  ;;  %v1052_v53 = vld [vmem:[%s1492_s17] ss:$0 sm:$0xff] }
 0x33e   :  { %v641_v62 = vmax.f32 %v638_v56, 0.0 }
 0x340   :  { %v642_v2 = vpack.c.bf16 %v641_v62, %v641_v62 }
 0x343   :  { %v639_v55 = vpop.f32.mrf.mxu1 }
 0x38e   :  { %v399_v13 = vpop.permute.xlu2 %398 }
 0x38f   :  { %v403_v17 = vsel %vm122_vm1, %v245_v15, %v399_v13  ;;  %v1033_v13 = vld [vmem:[%s1491_s16] sm:$0xff] }
 0x390   :  { %v409_v18 = vadd.f32 %v1047_v10, %v403_v17 }
 0x392   :  { %v411_v19 = vmax.f32 %v409_v18, 0.0 }
 0x39e   :  { %v397_v11 = vpop.permute.xlu1 %396 }
 0x39f   :  { %v402_v12 = vsel %vm122_vm1, %v242_v9, %v397_v11  ;;  %v1036_v9 = vld [vmem:[%s1491_s16 + $0x18] sm:$0xff] }
 0x3a0   :  { %v408_v14 = vadd.f32 %v1047_v10, %v402_v12  ;;  %v1035_v10 = vld [vmem:[%s1491_s16 + $0x10] sm:$0xff] }
 0x3a2   :  { %v410_v16 = vmax.f32 %v408_v14, 0.0 }
 0x3a4   :  { %933 = vmatmul.msk.f32.vlgmr.msrb.gmra.mxu0 %vm420_vm12, %v410_v16 }
 0x3ac   :  { %934 = vmatmul.msk.f32.gmra.mxu0 %vm420_vm12, %v411_v19 }
 0x3b4   :  { %719 = vmatmul.bf16.vlgmr.msra.gmra.mxu0 %v642_v2 }
 0x421   :  { %v444_v21 = vpop.f32.mrf.mxu0 }
 0x422   :  { %v455_v22 = vmul.f32 %v1048_v20, %v444_v21 }
 0x424   :  { %v457_v23 = vsel %vm87_vm0, %v455_v22, 0.0 }
 0x425   :  { %458 = vadd.xlane.f32.xlu0 %v457_v23 }
 0x429   :  { %v447_v24 = vpop.f32.mrf.mxu0 }
 0x42a   :  { %935 = vmatpush.xpose.msk.msrb.mxu3 %vm87_vm0, %v447_v24  ;;  %577 = vmatpush.msrb.mxu2 %v447_v24  ;;  %v456_v25 = vmul.f32 %v1048_v20, %v447_v24 }
 0x42c   :  { %578 = vmatpush.msrb.mxu2 %v444_v21  ;;  %v460_v27 = vsel %vm87_vm0, %v456_v25, 0.0 }
 0x42d   :  { %461 = vadd.xlane.f32.xlu0 %v460_v27 }
 0x42e   :  { %936 = vmatpush.xpose.msk.msrb.mxu3 %vm87_vm0, %v444_v21  ;;  %769 = vmatpush.bf16.msra.mxu2 %v1036_v9 }
 0x431   :  { %937 = vmatmul.msk.f32.vlgmr.msrb.gmra.mxu3 %vm87_vm0, %v450_v28  ;;  %v720_v12 = vpop.f32.mrf.mxu0 }
 0x432   :  { %770 = vmatpush.bf16.msra.mxu2 %v1035_v10  ;;  %v1054_v10 = vld [vmem:[%s1498_s23] ss:$0 sm:$0xff]  ;;  %s912_s23 = sshll.u32 %s1499_s24, 4  ;;  %s913_s23 = int_to_ptr.hbm [resolvable:$true] %s912_s23 }
 0x436   :  { %771 = vmatpush.bf16.msra.mxu2 %v1034_v26 }
 0x439   :  { %v722_v24 = vpop.f32.mrf.mxu0 }
 0x43a   :  { %772 = vmatpush.bf16.msra.mxu2 %v1033_v13 }
 0x498   :  { %v459_v32 = vpop.xlane.xlu0 %458 }
 0x4a0   :  { %v462_v35 = vpop.xlane.xlu0 %461 }
 0x4b4   :  { %v489_v33 = vpop.f32.mrf.mxu3 }
 0x4b5   :  { %v492_v34 = vperm.slane %v489_v33, 0 }
 0x4b7   :  { %v493_v36 = vadd.f32 %v492_v34, %v459_v32  ;;  %v494_v37 = vadd.f32 %v492_v34, %v462_v35 }
 0x4b9   :  { %vm495_vm13 = vcmp.ge.f32.partialorder %v493_v36, 0.0  ;;  %v497_v38 = vmul.f32 0.2, %v493_v36  ;;  %vm496_vm14 = vcmp.ge.f32.partialorder %v494_v37, 0.0  ;;  %v498_v39 = vmul.f32 0.2, %v494_v37 }
 0x4bb   :  { %v499_v41 = vsel %vm495_vm13, %v493_v36, %v497_v38  ;;  %v500_v42 = vsel %vm496_vm14, %v494_v37, %v498_v39  ;;  %v1050_v36 = vld [vmem:[%s1490_s15] ss:$0 sm:$0xff] }
 0x4bc   :  { %v501_v43 = vsel %vm81_vm2, %v499_v41, -1e+30  ;;  %v502_v44 = vsel %vm82_vm6, %v500_v42, -1e+30  ;;  %v721_v39 = vadd.f32 %v1050_v36, %v720_v12 }
 0x4bd   :  { %v503_v45 = vsel %vm87_vm0, %v501_v43, -inf  ;;  %v506_v46 = vsel %vm87_vm0, %v502_v44, -inf }
 0x4be   :  { %504 = vmax.xlane.f32.xlu0 %v503_v45  ;;  %507 = vmax.xlane.f32.xlu1 %v506_v46  ;;  %v724_v42 = vmax.f32 %v721_v39, 0.0  ;;  %v1051_v46 = vld [vmem:[%s1486_s11] ss:$0 sm:$0xff] }
 0x531   :  { %v508_v58 = vpop.xlane.xlu1 %507  ;;  %v505_v59 = vpop.xlane.xlu0 %504 }
 0x532   :  { %v510_v60 = vsub.f32 %v502_v44, %v508_v58  ;;  %v509_v61 = vsub.f32 %v501_v43, %v505_v59  ;;  %v725_v43 = vpack.c.bf16 %v724_v42, %v724_v42  ;;  %v1037_v44 = vld [vmem:[%s1493_s18] sm:$0xff] }
 0x533   :  { %827 = vmatpush.bf16.msrb.mxu1 %v1037_v44 }
 0x534   :  { %v513_v0 = vmul.f32 1.442695, %v510_v60  ;;  %v511_v1 = vmul.f32 1.442695, %v509_v61  ;;  %v1041_v60 = vld [vmem:[%s1497_s22] sm:$0xff] }
 0x535   :  { %v1040_v61 = vld [vmem:[%s1496_s21] sm:$0xff] }
 0x536   :  { %1071 = vpow2.f32 %v513_v0 }
 0x537   :  { %1073 = vpow2.f32 %v511_v1 }
 0x53c   :  { %v1072_v3 = vpop.eup %1071 }
 0x53d   :  { %v1074_v4 = vpop.eup %1073  ;;  %v516_v5 = vsel %vm82_vm6, %v1072_v3, 0.0 }
 0x53e   :  { %v520_v6 = vsel %vm87_vm0, %v516_v5, 0.0  ;;  %v515_v7 = vsel %vm81_vm2, %v1074_v4, 0.0 }
 0x53f   :  { %521 = vadd.xlane.f32.xlu0 %v520_v6  ;;  %v517_v8 = vsel %vm87_vm0, %v515_v7, 0.0 }
 0x540   :  { %518 = vadd.xlane.f32.xlu2 %v517_v8 }
 0x5b2   :  { %v522_v40 = vpop.xlane.xlu0 %521 }
 0x5b3   :  { %v519_v11 = vpop.xlane.xlu2 %518  ;;  %1075 = vrcp.f32 %v522_v40  ;;  %v549_v30 = vand.u32 2147483648, %v522_v40  ;;  %vm543_vm5 = vweird.f32 %v522_v40  ;;  %v547_v34 = vand.u32 2147483647, %v522_v40 }
 0x5b4   :  { %1077 = vrcp.f32 %v519_v11  ;;  %v534_v20 = vand.u32 2147483648, %v519_v11  ;;  %v532_v22 = vand.u32 2147483647, %v519_v11  ;;  %vm528_vm6 = vweird.f32 %v519_v11 }
 0x5b5   :  { %v550_v37 = vor.u32 1.1754944e-38, %v549_v30  ;;  %vm548_vm8 = vcmp.eq.f32.partialorder %v547_v34, 8.507059e+37 }
 0x5b6   :  { %v535_v27 = vor.u32 1.1754944e-38, %v534_v20  ;;  %vm533_vm3 = vcmp.eq.f32.partialorder %v532_v22, 8.507059e+37 }
 0x5b9   :  { %v1076_v14 = vpop.eup %1075 }
 0x5ba   :  { %v1078_v15 = vpop.eup %1077  ;;  %v539_v16 = vmul.f32 %v1076_v14, %v522_v40  ;;  %vm544_vm4 = vweird.f32 %v1076_v14 }
 0x5bb   :  { %v524_v17 = vmul.f32 %v1078_v15, %v519_v11  ;;  %vm529_vm2 = vweird.f32 %v1078_v15  ;;  %vm545_vm7 = vmor %vm543_vm5, %vm544_vm4 }
 0x5bc   :  { %v540_v18 = vsub.f32 1.0, %v539_v16  ;;  %vm530_vm15 = vmor %vm528_vm6, %vm529_vm2 }
 0x5bd   :  { %v525_v19 = vsub.f32 1.0, %v524_v17 }
 0x5be   :  { %v541_v23 = vmul.f32 %v1076_v14, %v540_v18 }
 0x5bf   :  { %v526_v21 = vmul.f32 %v1078_v15, %v525_v19 }
 0x5c0   :  { %v542_v29 = vadd.f32 %v1076_v14, %v541_v23 }
 0x5c1   :  { %v527_v25 = vadd.f32 %v1078_v15, %v526_v21 }
 0x5c2   :  { %v546_v35 = vsel %vm545_vm7, %v1076_v14, %v542_v29 }
 0x5c3   :  { %v531_v28 = vsel %vm530_vm15, %v1078_v15, %v527_v25  ;;  %v551_v38 = vsel %vm548_vm8, %v550_v37, %v546_v35 }
 0x5c4   :  { %v536_v32 = vsel %vm533_vm3, %v535_v27, %v531_v28  ;;  %v552_v41 = vmul.f32 %v551_v38, %v516_v5 }
 0x5c5   :  { %v537_v33 = vmul.f32 %v536_v32, %v515_v7 }
 0x5c7   :  { %938 = vmatmul.msk.f32.vlgmr.msrb.gmra.mxu2 %vm87_vm0, %v537_v33 }
 0x5c8   :  { %860 = vmatpush.bf16.msrb.mxu2 %v1041_v60 }
 0x5cf   :  { %939 = vmatmul.msk.f32.gmra.mxu2 %vm87_vm0, %v552_v41 }
 0x5d7   :  { %998 = vmatmul.msk.bf16.vlgmr.msra.gmra.mxu2 %vm420_vm12, %v725_v43 }
 0x64a   :  { %v580_v45 = vpop.f32.mrf.mxu2 }
 0x64b   :  { %v581_v48 = vadd.f32 %v1051_v46, %v580_v45 }
 0x652   :  { %v583_v47 = vpop.f32.mrf.mxu2 }
 0x653   :  { %v584_v49 = vadd.f32 %v1051_v46, %v583_v47 }
 0x655   :  { %v587_v51 = vpack.c.bf16 %v584_v49, %v581_v48 }
 0x657   :  { %598 = vmatpush.bf16.msra.mxu3 %v587_v51 }
 0x65a   :  { %940 = vmatmul.msk.bf16.vlgmr.msra.gmra.mxu3 %vm87_vm0, %v586_v52  ;;  %v774_v55 = vpop.f32.mrf.mxu2 }
 0x65b   :  { %804 = vmatpush.bf16.msrb.mxu3 %v1039_v50  ;;  %v775_v56 = vadd.f32 %v1052_v53, %v774_v55 }
 0x65d   :  { %v778_v57 = vmax.f32 %v775_v56, 0.0 }
 0x65f   :  { %805 = vmatpush.bf16.msrb.mxu3 %v1038_v54  ;;  %v779_v58 = vpack.c.bf16 %v778_v57, %v778_v57 }
 0x661   :  { %1012 = vmatmul.msk.bf16.vlgmr.msrb.gmra.mxu1 %vm87_vm0, %v779_v58 }
 0x662   :  { %v776_v59 = vpop.f32.mrf.mxu2 }
 0x663   :  { %882 = vmatpush.bf16.msra.mxu3 %v1040_v61 }
 0x66a   :  { %1007 = vmatmul.msk.bf16.vlgmr.msrb.gmra.mxu3 %vm122_vm1, %v1375_v31  ;;  %v1053_v31 = vld [vmem:[%s1495_s20] ss:$0 sm:$0xff]  ;;  %s1111_s20 = smov [#allocation2]  }
 0x66b   :  { %s910_s12 = sshll.u32 %s1111_s20, 4  ;;  %s911_s12 = int_to_ptr.vmem [resolvable:$true] %s910_s12 }
 0x6dd   :  { %v600_v62 = vpop.f32.mrf.mxu3 }
 0x6de   :  { %v841_v63 = vpack.c.bf16 %v600_v62, %v600_v62  ;;  %v829_v0 = vpop.f32.mrf.mxu1 }
 0x6e0   :  { %1017 = vmatmul.msk.bf16.vlgmr.msrb.gmra.mxu2 %vm87_vm0, %v841_v63 }
 0x6e5   :  { %v602_v1 = vpop.f32.mrf.mxu3 }
 0x6e6   :  { %v831_v2 = vpop.f32.mrf.mxu1 }
 0x6ed   :  { %v807_v3 = vpop.f32.mrf.mxu3 }
 0x6ee   :  { %v830_v4 = vadd.f32 %v829_v0, %v807_v3 }
 0x6f0   :  { %v837_v5 = vadd.f32 %v1053_v31, %v830_v4 }
 0x6f2   :  { %v838_v6 = vpack.c.bf16 %v837_v5, %v837_v5 }
 0x6f4   :  { %1022 = vmatmul.msk.bf16.vlgmr.msra.gmra.mxu3 %vm87_vm0, %v838_v6 }
 0x6f5   :  { %v809_v7 = vpop.f32.mrf.mxu3 }
 0x763   :  { %v862_v8 = vpop.f32.mrf.mxu2 }
 0x76b   :  { %v864_v9 = vpop.f32.mrf.mxu2 }
 0x777   :  { %v884_v40 = vpop.f32.mrf.mxu3 }
 0x778   :  { %v885_v11 = vadd.f32 %v884_v40, %v862_v8 }
 0x77a   :  { %v892_v26 = vadd.f32 %v1054_v10, %v885_v11 }
 0x77c   :  { %893 = vmax.xlane.f32.xlu0 %v892_v26 }
 0x77f   :  { %v886_v12 = vpop.f32.mrf.mxu3 }
 0x7ef   :  { %v894_v13 = vpop.xlane.xlu0 %893 }
 0x7f0   :  { %v895_v14 = vsub.f32 %v892_v26, %v894_v13 }
 0x7f2   :  { %v896_v15 = vmul.f32 1.442695, %v895_v14 }
 0x7f4   :  { %1079 = vpow2.f32 %v896_v15 }
 0x7fa   :  { %v1080_v16 = vpop.eup %1079 }
 0x7fb   :  { %898 = vadd.xlane.f32.xlu0 %v1080_v16 }
 0x86e   :  { %v899_v17 = vpop.xlane.xlu0 %898 }
 0x86f   :  { %1081 = vlog2.f32 %v899_v17 }
 0x875   :  { %v1082_v18 = vpop.eup %1081 }
 0x876   :  { %v901_v19 = vmul.f32 0.6931472, %v1082_v18 }
 0x878   :  { %v902_v20 = vsub.f32 %v895_v14, %v901_v19 }
 0x87a   :  { %v903_v21 = vpack.c.bf16 %v902_v20, %v902_v20 }
 0x87c   :  { %904 = vst [vmem:[#allocation2] sm:$0xf] %v903_v21 }
 0x87d   :  { %915 = dma.vmem_to_hbm [thread:$0]  %s911_s12, 64, %s913_s23, [#allocation3]  }
 0x87e   :  { %1107 = dma.done.wait [#allocation3], 64  }
 0x87f   :  { %1108 = vsyncadd [#allocation3], 4294967232 }
 0x880   :  { %920 = vsyncpa [#allocation3], 1 }

</bundles_post_ra>
